<compile_context>
chip_gen: v7x
topology: tpu7x:2x2x1
jax: 0.10.0
libtpu: 0.0.40
codegen_flags: <defaults>
</compile_context>

<pallas_src>
import jax
import jax.numpy as jnp
from jax.experimental import pallas as pl
from jax.experimental.pallas import tpu as pltpu

# Layer sizes from the PyTorch module.
DIMS = [13, 11, 9, 7, 5, 3, 1]
IN_F = DIMS[0]   # 13


def affine_sigmoid_kernel(xT_ref, wb_ref, o_ref):
    # xT_ref: (13, TB)  features on sublanes, batch on lanes (lane-dense)
    # wb_ref: (14, 1)   rows 0..12 = W_eff, row 13 = b_eff
    # o_ref : (1, TB)   lane-dense output block
    x = xT_ref[...]                       # (13, TB)
    wb = wb_ref[...]                      # (14, 1)
    w = wb[:IN_F, :]                      # (13, 1)
    b = wb[IN_F:, :]                      # (1, 1)
    # VPU broadcast-multiply + XLU sublane reduce; no MXU needed for K=13, N=1.
    acc = jnp.sum(x * w, axis=0, keepdims=True) + b   # (1, TB)
    o_ref[...] = jax.nn.sigmoid(acc).astype(o_ref.dtype)


def init_params(key):
    """Per-layer params mimicking torch.nn.Linear default init.
    Weights stored as (in, out), biases as (1, out)."""
    params = []
    for i in range(len(DIMS) - 1):
        fan_in, fan_out = DIMS[i], DIMS[i + 1]
        key, kw, kb = jax.random.split(key, 3)
        bound = 1.0 / jnp.sqrt(jnp.float32(fan_in))
        w = jax.random.uniform(kw, (fan_in, fan_out), jnp.float32, -bound, bound)
        b = jax.random.uniform(kb, (1, fan_out), jnp.float32, -bound, bound)
        params.append((w, b))
    return params


def model_forward(x, params, *, tb=512):
    """x: (B, 13) f32. Returns (B, 1) f32 = sigmoid(L6(L5(...L1(x))))."""
    B, F = x.shape
    assert F == IN_F

    # Collapse the purely-affine layer chain into one 13->1 affine map (exact,
    # since the original module has no activations between Linear layers).
    w_eff, b_eff = params[0]
    for w, b in params[1:]:
        b_eff = b_eff @ w + b
        w_eff = w_eff @ w
    wb = jnp.concatenate([w_eff, b_eff], axis=0)       # (14, 1)

    # Pad batch to a multiple of the tile and go feature-major (batch on lanes).
    n_blocks = pl.cdiv(B, tb)
    b_pad = n_blocks * tb
    x_pad = jnp.pad(x, ((0, b_pad - B), (0, 0)))
    xT = x_pad.T                                       # (13, B_pad)

    yT = pl.pallas_call(
        affine_sigmoid_kernel,
        out_shape=jax.ShapeDtypeStruct((1, b_pad), jnp.float32),
        grid=(n_blocks,),
        in_specs=[
            pl.BlockSpec((IN_F, tb), lambda i: (0, i)),       # x tile, pipelined
            pl.BlockSpec((IN_F + 1, 1), lambda i: (0, 0)),    # packed params, resident
        ],
        out_specs=pl.BlockSpec((1, tb), lambda i: (0, i)),
        compiler_params=pltpu.CompilerParams(
            dimension_semantics=("parallel",)),
    )(xT, wb)

    return yT[:, :B].T                                 # back to (B, 1)


def reference_forward(x, params):
    """Layer-by-layer reference matching the PyTorch forward exactly."""
    h = x
    for w, b in params:
        h = h @ w + b
    return jax.nn.sigmoid(h)


if __name__ == "__main__":
    key = jax.random.PRNGKey(0)
    kx, kp = jax.random.split(key)

    B = 8  # small batch for the demo; kernel tiles/pads to TB=512 internally
    x = jax.random.normal(kx, (B, IN_F), jnp.float32)
    params = init_params(kp)

    y = model_forward(x, params)
    y = jax.block_until_ready(y)

    y_ref = reference_forward(x, params)
    assert y.shape == (B, 1)
    assert jnp.allclose(y, y_ref, atol=1e-5, rtol=1e-5)

    print("KERNEL_OK")
</pallas_src>

<mosaic_0001>
module attributes {stable_mosaic.version = 11 : i64} {
  func.func @affine_sigmoid_kernel(%arg0: i32, %arg1: memref<13x512xf32, #tpu.memory_space<vmem>>, %arg2: memref<14x1xf32, #tpu.memory_space<vmem>>, %arg3: memref<1x512xf32, #tpu.memory_space<vmem>>) attributes {dimension_semantics = [#tpu.dimension_semantics<parallel>], iteration_bounds = array<i64: 1>, scalar_prefetch = 0 : i64, scratch_operands = 0 : i64, tpu.core_type = #tpu.core_type<tc>, window_params = [{transform_indices = @transform_0, window_bounds = array<i64: 13, 512>}, {pipeline_mode = #tpu.pipeline_mode<synchronous>, transform_indices = @transform_1, window_bounds = array<i64: 14, 1>}, {transform_indices = @transform_2, window_bounds = array<i64: 1, 512>}]} {
    %c0 = arith.constant 0 : index
    %c0_0 = arith.constant 0 : index
    %0 = vector.load %arg1[%c0, %c0_0] : memref<13x512xf32, #tpu.memory_space<vmem>>, vector<13x512xf32>
    %c0_1 = arith.constant 0 : index
    %c0_2 = arith.constant 0 : index
    %1 = vector.load %arg2[%c0_1, %c0_2] : memref<14x1xf32, #tpu.memory_space<vmem>>, vector<14x1xf32>
    %2 = vector.extract_strided_slice %1 {offsets = [0, 0], sizes = [13, 1], strides = [1, 1]} : vector<14x1xf32> to vector<13x1xf32>
    %3 = vector.extract_strided_slice %1 {offsets = [13, 0], sizes = [1, 1], strides = [1, 1]} : vector<14x1xf32> to vector<1x1xf32>
    %4 = vector.broadcast %2 : vector<13x1xf32> to vector<13x512xf32>
    %5 = arith.mulf %0, %4 : vector<13x512xf32>
    %cst = arith.constant dense<0.000000e+00> : vector<512xf32>
    %6 = vector.multi_reduction <add>, %5, %cst [0] : vector<13x512xf32> to vector<512xf32>
    %7 = vector.shape_cast %6 : vector<512xf32> to vector<1x512xf32>
    %8 = vector.broadcast %3 : vector<1x1xf32> to vector<1x512xf32>
    %9 = arith.addf %7, %8 : vector<1x512xf32>
    %10 = arith.negf %9 : vector<1x512xf32>
    %11 = math.exp %10 : vector<1x512xf32>
    %cst_3 = arith.constant 1.000000e+00 : f32
    %12 = vector.broadcast %cst_3 : f32 to vector<1x512xf32>
    %13 = arith.addf %12, %11 : vector<1x512xf32>
    %14 = arith.divf %12, %13 : vector<1x512xf32>
    %c0_4 = arith.constant 0 : index
    %c0_5 = arith.constant 0 : index
    %15 = vector.load %arg3[%c0_4, %c0_5] : memref<1x512xf32, #tpu.memory_space<vmem>>, vector<1x512xf32>
    tpu.vector_store %arg3[%c0_4, %c0_5], %14 {strides = array<i32>} : memref<1x512xf32, #tpu.memory_space<vmem>>, vector<1x512xf32>,
    return
  }
  func.func @transform_0(%arg0: i32) -> (i32, i32) {
    %c0_i32 = arith.constant 0 : i32
    %c0_i32_0 = arith.constant 0 : i32
    return %c0_i32, %arg0 : i32, i32
  }
  func.func @transform_1(%arg0: i32) -> (i32, i32) {
    %c0_i32 = arith.constant 0 : i32
    %c0_i32_0 = arith.constant 0 : i32
    %c0_i32_1 = arith.constant 0 : i32
    return %c0_i32, %c0_i32_0 : i32, i32
  }
  func.func @transform_2(%arg0: i32) -> (i32, i32) {
    %c0_i32 = arith.constant 0 : i32
    %c0_i32_0 = arith.constant 0 : i32
    return %c0_i32, %arg0 : i32, i32
  }
}

</mosaic_0001>

<bundles_post_ra>
// kernel: tpu_custom_call.1
= control target key start
LH: loop header
LB: loop body
LE: loop exit
PB: predicated region body
PF: predicated region fallthrough
CT: control target
= control target key end

     0   :  { %7 = vsyncpa [#allocation3], 0  ;;  %s290_s0 = inlined_call_operand.hbm [shape: f32[13,512], index: 0, kind: input, shape index: {}]   ;;  %s291_s1 = inlined_call_operand.vmem [shape: f32[14,1], index: 1, kind: input, shape index: {}]   ;;  %s292_s2 = inlined_call_operand.hbm [shape: f32[1,512], index: 2, kind: output, shape index: {}]  }
   0x1   :  { %8 = vsyncpa [#allocation4], 0  ;;  %s239_s9 = smov [#allocation2]   ;;  %s191_s13 = scalar_lea.hbm %s290_s0, 1024 }
   0x2   :  { %s14_s10 = sshll.u32 %s239_s9, 4  ;;  %p192_p0 = scmp.ne.s32.totalorder %s290_s0, %s191_s13  ;;  %s15_s10 = int_to_ptr.vmem [resolvable:$true] %s14_s10 }
   0x3   :  { %p195_p1 = scmp.lt.u32.totalorder %s191_s13, %s290_s0 }
   0x5   :  { %p197_p2 = pnand %p195_p1, %p192_p0 }
   0x7   :  { %200 = shalt.err (!%p197_p2)
}
   0x8   :  { %s201_s18 = scalar_lea.vmem %s15_s10, 1024  ;;  %p206_p4 = scmp.lt.s32.totalorder %s15_s10, %s15_s10 }
   0x9   :  { %p202_p3 = scmp.ne.s32.totalorder %s15_s10, %s201_s18  ;;  %p207_p5 = scmp.lt.s32.totalorder %s201_s18, %s201_s18 }
   0xb   :  { %p208_p6 = por %p207_p5, %p206_p4 }
   0xd   :  { %p209_p7 = pnand %p208_p6, %p202_p3 }
   0xf   :  { %212 = shalt.err (!%p209_p7)
}
  0x10   :  { %s240_s19 = smov 512   ;;  %s241_s20 = smov 32  }
  0x11   :  { %20 = dma.hbm_to_vmem [thread:$0]  %s290_s0, 1024, %s15_s10, [#allocation3], %s240_s19, %s240_s19, %s241_s20  }
  0x12   :  { %235 = dma.done.wait [#allocation3], 1024  }
  0x13   :  { %236 = vsyncadd [#allocation3], 4294966272  ;;  %v242_v0 = vmov 0   ;;  %v35_v1 = vld [vmem:[%s291_s1 + $0x8] sm:$0x3f]  ;;  %v34_v2 = vld [vmem:[%s291_s1] sm:$0xff] }
  0x14   :  { %174 = vset.pattern.permute.xlu0 %v242_v0  ;;  %v30_v3 = vld [vmem:[#allocation2 + $0x20] sm:$0x1f]  ;;  %v31_v4 = vld [vmem:[#allocation2 + $0x28] sm:$0x1f]  ;;  %v32_v5 = vld [vmem:[#allocation2 + $0x30] sm:$0x1f] }
  0x15   :  { %43 = vperm.xlu0 %174, %v35_v1   ;;  %v33_v6 = vld [vmem:[#allocation2 + $0x38] sm:$0x1f]  ;;  %v26_v8 = vld [vmem:[#allocation2] sm:$0xff]  ;;  %v27_v9 = vld [vmem:[#allocation2 + $0x8] sm:$0xff]  ;;  %vm54_vm0 = vcmask 1044480   ;;  %s244_s0 = smov [#allocation5]  }
  0x16   :  { %v28_v10 = vld [vmem:[#allocation2 + $0x10] sm:$0xff]  ;;  %v29_v11 = vld [vmem:[#allocation2 + $0x18] sm:$0xff]  ;;  %s155_s1 = sshll.u32 %s244_s0, 4  ;;  %s156_s1 = int_to_ptr.vmem [resolvable:$true] %s155_s1 }
  0x17   :  { %s213_s27 = scalar_lea.vmem %s156_s1, 64  ;;  %p218_p9 = scmp.lt.s32.totalorder %s156_s1, %s156_s1 }
  0x18   :  { %p214_p8 = scmp.ne.s32.totalorder %s156_s1, %s213_s27  ;;  %p219_p10 = scmp.lt.s32.totalorder %s213_s27, %s213_s27 }
  0x19   :  { %38 = vperm.xlu0 %174, %v34_v2  }
  0x1a   :  { %p220_p11 = por %p219_p10, %p218_p9 }
  0x1c   :  { %p221_p12 = pnand %p220_p11, %p214_p8 }
  0x94   :  { %v44_v7 = vpop.permute.xlu0 %43 }
  0x95   :  { %v50_v12 = vmul.f32 %v44_v7, %v30_v3  ;;  %v51_v13 = vmul.f32 %v44_v7, %v31_v4  ;;  %v52_v14 = vmul.f32 %v44_v7, %v32_v5  ;;  %v53_v15 = vmul.f32 %v44_v7, %v33_v6 }
  0x96   :  { %v243_v5 = vmov 1966171168  }
  0x97   :  { %v55_v21 = vsel %vm54_vm0, %v50_v12, 0.0  ;;  %v63_v22 = vsel %vm54_vm0, %v51_v13, 0.0  ;;  %v71_v23 = vsel %vm54_vm0, %v52_v14, 0.0  ;;  %v79_v24 = vsel %vm54_vm0, %v53_v15, 0.0 }
  0x98   :  { %v39_v16 = vpop.permute.xlu0 %38  ;;  %v122_v6 = vunpack.c.l.s4 %v243_v5 }
  0x99   :  { %v46_v17 = vmul.f32 %v39_v16, %v26_v8  ;;  %v47_v18 = vmul.f32 %v39_v16, %v27_v9  ;;  %v48_v19 = vmul.f32 %v39_v16, %v28_v10  ;;  %v49_v20 = vmul.f32 %v39_v16, %v29_v11 }
  0x9a   :  { %v123_v8 = vunpack.c.0.s8 %v122_v6 }
  0x9b   :  { %v56_v25 = vadd.f32 %v55_v21, %v46_v17  ;;  %v64_v26 = vadd.f32 %v63_v22, %v47_v18  ;;  %v72_v27 = vadd.f32 %v71_v23, %v48_v19  ;;  %v80_v28 = vadd.f32 %v79_v24, %v49_v20 }
  0x9d   :  { %v57_v29 = vrot.slane %v56_v25, 4  ;;  %v65_v30 = vrot.slane %v64_v26, 4  ;;  %v73_v31 = vrot.slane %v72_v27, 4  ;;  %v81_v32 = vrot.slane %v80_v28, 4 }
  0x9f   :  { %v58_v33 = vadd.f32 %v57_v29, %v56_v25  ;;  %v66_v34 = vadd.f32 %v65_v30, %v64_v26  ;;  %v74_v35 = vadd.f32 %v73_v31, %v72_v27  ;;  %v82_v36 = vadd.f32 %v81_v32, %v80_v28 }
  0xa1   :  { %v59_v37 = vrot.slane %v58_v33, 2  ;;  %v67_v38 = vrot.slane %v66_v34, 2  ;;  %v75_v39 = vrot.slane %v74_v35, 2  ;;  %v83_v40 = vrot.slane %v82_v36, 2 }
  0xa3   :  { %v60_v41 = vadd.f32 %v59_v37, %v58_v33  ;;  %v68_v42 = vadd.f32 %v67_v38, %v66_v34  ;;  %v76_v43 = vadd.f32 %v75_v39, %v74_v35  ;;  %v84_v44 = vadd.f32 %v83_v40, %v82_v36 }
  0xa5   :  { %v61_v45 = vrot.slane %v60_v41, 1  ;;  %v69_v46 = vrot.slane %v68_v42, 1  ;;  %v77_v47 = vrot.slane %v76_v43, 1  ;;  %v85_v48 = vrot.slane %v84_v44, 1 }
  0xa7   :  { %v62_v49 = vadd.f32 %v61_v45, %v60_v41  ;;  %v70_v50 = vadd.f32 %v69_v46, %v68_v42  ;;  %v78_v51 = vadd.f32 %v77_v47, %v76_v43  ;;  %v86_v52 = vadd.f32 %v85_v48, %v84_v44 }
  0xa9   :  { %v87_v53 = vadd.f32 %v62_v49, %v44_v7  ;;  %v88_v54 = vadd.f32 %v70_v50, %v44_v7  ;;  %v89_v55 = vadd.f32 %v78_v51, %v44_v7  ;;  %v90_v56 = vadd.f32 %v86_v52, %v44_v7 }
  0xaa   :  { %v124_v7 = vlaneseq }
  0xab   :  { %v164_v57 = vmul.f32 -1.442695, %v87_v53  ;;  %v165_v58 = vmul.f32 -1.442695, %v88_v54  ;;  %v166_v59 = vmul.f32 -1.442695, %v89_v55 }
  0xac   :  { %v167_v60 = vmul.f32 -1.442695, %v90_v56  ;;  %v125_v9 = vshrl.u32 %v124_v7, 7  ;;  %vm146_vm1 = vcmp.lt.s32.totalorder %v124_v7, 512 }
  0xad   :  { %175 = vpow2.f32 %v164_v57 }
  0xae   :  { %177 = vpow2.f32 %v165_v58  ;;  %v126_v11 = vsub.s32 %v123_v8, %v125_v9 }
  0xaf   :  { %179 = vpow2.f32 %v166_v59 }
  0xb0   :  { %181 = vpow2.f32 %v167_v60 }
  0xb7   :  { %v176_v61 = vpop.eup %175 }
  0xb8   :  { %v178_v62 = vpop.eup %177  ;;  %v103_v63 = vadd.f32 1.0, %v176_v61 }
  0xb9   :  { %v180_v0 = vpop.eup %179  ;;  %v104_v1 = vadd.f32 1.0, %v178_v62 }
  0xba   :  { %v182_v2 = vpop.eup %181  ;;  %v105_v3 = vadd.f32 1.0, %v180_v0  ;;  %183 = vrcp.f32 %v103_v63 }
  0xbb   :  { %v106_v4 = vadd.f32 1.0, %v182_v2  ;;  %185 = vrcp.f32 %v104_v1 }
  0xbc   :  { %187 = vrcp.f32 %v105_v3 }
  0xbd   :  { %189 = vrcp.f32 %v106_v4 }
  0xc4   :  { %v184_v10 = vpop.eup %183 }
  0xc5   :  { %v186_v12 = vpop.eup %185 }
  0xc6   :  { %v188_v13 = vpop.eup %187  ;;  %v119_v14 = vcombine.high %v184_v10, %v186_v12 }
  0xc7   :  { %v190_v15 = vpop.eup %189 }
  0xc8   :  { %v120_v16 = vcombine.high %v188_v13, %v190_v15  ;;  %v127_v17 = vrot.slane %v119_v14, %v126_v11 }
  0xca   :  { %v134_v18 = vrot.slane %v120_v16, %v126_v11 }
  0xcc   :  { %v135_v19 = vcombine.high %v127_v17, %v134_v18 }
  0xce   :  { %v142_v20 = vrot.slane %v135_v19, %v126_v11 }
  0xd0   :  { %148 = vst.msk [vmem:[#allocation5] sm:$0xf] %vm146_vm1, %v142_v20 }
  0xd1   :  { %224 = shalt.err (!%p221_p12)
}
  0xd2   :  { %s225_s30 = scalar_lea.hbm %s292_s2, 64 }
  0xd3   :  { %p226_p13 = scmp.ne.s32.totalorder %s292_s2, %s225_s30  ;;  %p229_p0 = scmp.lt.u32.totalorder %s225_s30, %s292_s2 }
  0xd5   :  { %p231_p1 = pnand %p229_p0, %p226_p13 }
  0xd7   :  { %234 = shalt.err (!%p231_p1)
}
  0xd8   :  { %158 = dma.vmem_to_hbm [thread:$0]  %s156_s1, 64, %s292_s2, [#allocation4]  }
  0xd9   :  { %237 = dma.done.wait [#allocation4], 64  }
  0xda   :  { %238 = vsyncadd [#allocation4], 4294967232 }
  0xdb   :  { %162 = vsyncpa [#allocation3], 1 }
  0xdc   :  { %163 = vsyncpa [#allocation4], 1 }

</bundles_post_ra>
